<compile_context>
chip_gen: v6e
topology: v6e:2x2x1
jax: 0.10.0
libtpu: 0.0.40
codegen_flags: <defaults>
</compile_context>

<pallas_src>
import math
import numpy as np
import jax
import jax.numpy as jnp
from jax.experimental import pallas as pl
from jax.experimental.pallas import tpu as pltpu

LANE = 128
SUBLANE = 8


def _round_up(x, m):
    return (x + m - 1) // m * m


# ---------------------------------------------------------------------------
# Pallas kernel: FC stack (4x Linear+ReLU) + folded theta/basis projection.
# ---------------------------------------------------------------------------
def nbeats_seasonal_kernel(
    x_ref,
    w1_ref, b1_ref,
    w2_ref, b2_ref,
    w3_ref, b3_ref,
    w4_ref, b4_ref,
    wout_ref,
    out_ref,
):
    h = jnp.dot(x_ref[...], w1_ref[...], preferred_element_type=jnp.float32) + b1_ref[...]
    h = jnp.maximum(h, 0.0)
    # TODO(synk): nn.Dropout training-mode random masks are not reproduced;
    # eval-mode (identity) semantics are used here.
    h = jnp.dot(h, w2_ref[...], preferred_element_type=jnp.float32) + b2_ref[...]
    h = jnp.maximum(h, 0.0)
    h = jnp.dot(h, w3_ref[...], preferred_element_type=jnp.float32) + b3_ref[...]
    h = jnp.maximum(h, 0.0)
    h = jnp.dot(h, w4_ref[...], preferred_element_type=jnp.float32) + b4_ref[...]
    h = jnp.maximum(h, 0.0)
    # Theta projection folded into the padded, lane-dense basis: one matmul,
    # one unmasked store of a (TILE_B, L_pad) slab.
    out_ref[...] = jnp.dot(h, wout_ref[...], preferred_element_type=jnp.float32)


# ---------------------------------------------------------------------------
# Host-side parameter / buffer construction (mirrors the PyTorch module).
# ---------------------------------------------------------------------------
def linspace_np(backcast_length, forecast_length, centered=False):
    if centered:
        norm = max(backcast_length, forecast_length)
        start = -backcast_length
        stop = forecast_length - 1
    else:
        norm = backcast_length + forecast_length
        start = 0
        stop = backcast_length + forecast_length - 1
    lin_space = np.linspace(
        start / norm, stop / norm, backcast_length + forecast_length, dtype=np.float32
    )
    return lin_space[:backcast_length], lin_space[backcast_length:]


def make_seasonal_basis(backcast_length, forecast_length, thetas_dim, min_period=1):
    b_ls, f_ls = linspace_np(backcast_length, forecast_length, centered=False)
    if thetas_dim % 2 == 0:
        p1, p2 = thetas_dim // 2, thetas_dim // 2
    else:
        p1, p2 = thetas_dim // 2, thetas_dim // 2 + 1
    total = (backcast_length + forecast_length) / min_period
    f1 = np.linspace(0, total, p1)
    f2 = np.linspace(0, total, p2)
    s1_b = np.cos(2 * np.pi * f1[:, None] * b_ls).astype(np.float32)
    s2_b = np.sin(2 * np.pi * f2[:, None] * b_ls).astype(np.float32)
    s1_f = np.cos(2 * np.pi * f1[:, None] * f_ls).astype(np.float32)
    s2_f = np.sin(2 * np.pi * f2[:, None] * f_ls).astype(np.float32)
    S_backcast = np.concatenate([s1_b, s2_b], axis=0)  # (thetas_dim, backcast)
    S_forecast = np.concatenate([s1_f, s2_f], axis=0)  # (thetas_dim, forecast)
    return jnp.asarray(S_backcast), jnp.asarray(S_forecast)


def init_params(key, backcast_length, units, thetas_dim):
    """Deterministic Kaiming-uniform-like init; weights stored as (in, out)."""
    def lin_init(k, fan_in, fan_out, bias=True):
        kw, kb = jax.random.split(k)
        bound = 1.0 / math.sqrt(fan_in)
        w = jax.random.uniform(kw, (fan_in, fan_out), jnp.float32, -bound, bound)
        if bias:
            b = jax.random.uniform(kb, (1, fan_out), jnp.float32, -bound, bound)
            return w, b
        return w, None

    keys = jax.random.split(key, 5)
    w1, b1 = lin_init(keys[0], backcast_length, units)
    w2, b2 = lin_init(keys[1], units, units)
    w3, b3 = lin_init(keys[2], units, units)
    w4, b4 = lin_init(keys[3], units, units)
    wtheta, _ = lin_init(keys[4], units, thetas_dim, bias=False)
    return (w1, b1, w2, b2, w3, b3, w4, b4, wtheta)


def _pad2(a, rows, cols):
    a = np.asarray(a, dtype=np.float32)
    return jnp.asarray(np.pad(a, ((0, rows - a.shape[0]), (0, cols - a.shape[1]))))


def prepare_padded_params(params, S_backcast, S_forecast):
    """Pad weights/biases to (8,128)-aligned shapes and fold theta into basis."""
    w1, b1, w2, b2, w3, b3, w4, b4, wtheta = params
    backcast_length = w1.shape[0]
    units = w1.shape[1]
    thetas_dim, forecast_length = np.asarray(S_forecast).shape

    d_in_p = _round_up(backcast_length, LANE)
    u_p = _round_up(units, LANE)
    l_total = backcast_length + forecast_length
    l_p = _round_up(l_total, LANE)

    # Fold shared theta_b_fc == theta_f_fc into the concatenated basis (host,
    # full f32 precision).
    basis = np.concatenate(
        [np.asarray(S_backcast, np.float32), np.asarray(S_forecast, np.float32)], axis=1
    )  # (thetas_dim, l_total)
    w_out = np.asarray(wtheta, np.float32) @ basis  # (units, l_total)

    padded = (
        _pad2(w1, d_in_p, u_p), _pad2(b1, 1, u_p),
        _pad2(w2, u_p, u_p),    _pad2(b2, 1, u_p),
        _pad2(w3, u_p, u_p),    _pad2(b3, 1, u_p),
        _pad2(w4, u_p, u_p),    _pad2(b4, 1, u_p),
        _pad2(w_out, u_p, l_p),
    )
    dims = dict(d_in_p=d_in_p, u_p=u_p, l_p=l_p,
                backcast_length=backcast_length, forecast_length=forecast_length)
    return padded, dims


# ---------------------------------------------------------------------------
# Wrapper: batch-gridded pallas_call with resident weights.
# ---------------------------------------------------------------------------
def nbeats_seasonal_forward(x, params, S_backcast, S_forecast, *, tile_b=128):
    batch, backcast_length = x.shape
    padded_params, dims = prepare_padded_params(params, S_backcast, S_forecast)
    d_in_p, u_p, l_p = dims["d_in_p"], dims["u_p"], dims["l_p"]
    forecast_length = dims["forecast_length"]
    l_total = backcast_length + forecast_length

    # Batch tiling: align to the 8-sublane granule, pad batch to a whole
    # number of tiles so every grid step is a full, unmasked block.
    b_align = _round_up(batch, SUBLANE)
    tile_b = min(tile_b, b_align)
    b_pad = _round_up(b_align, tile_b)
    grid = (b_pad // tile_b,)

    x_p = _pad2(x, b_pad, d_in_p)

    def resident(a):
        nd = a.ndim
        return pl.BlockSpec(a.shape, lambda i, _nd=nd: (0,) * _nd)

    in_specs = [pl.BlockSpec((tile_b, d_in_p), lambda i: (i, 0))]
    in_specs += [resident(a) for a in padded_params]
    out_spec = pl.BlockSpec((tile_b, l_p), lambda i: (i, 0))

    flops = 2 * b_pad * (d_in_p * u_p + 3 * u_p * u_p + u_p * l_p)
    bytes_accessed = 4 * (
        b_pad * d_in_p + b_pad * l_p
        + d_in_p * u_p + 3 * u_p * u_p + u_p * l_p + 4 * u_p
    )

    combined = pl.pallas_call(
        nbeats_seasonal_kernel,
        out_shape=jax.ShapeDtypeStruct((b_pad, l_p), jnp.float32),
        grid=grid,
        in_specs=in_specs,
        out_specs=out_spec,
        compiler_params=pltpu.CompilerParams(
            dimension_semantics=("parallel",),
        ),
        cost_estimate=pl.CostEstimate(
            flops=int(flops), transcendentals=0, bytes_accessed=int(bytes_accessed)
        ),
    )(x_p, *padded_params)

    backcast = combined[:batch, :backcast_length]
    forecast = combined[:batch, backcast_length:l_total]
    return backcast, forecast


# ---------------------------------------------------------------------------
# Pure-JAX reference (two-step, unpadded) for correctness check.
# ---------------------------------------------------------------------------
def reference_forward(x, params, S_backcast, S_forecast):
    w1, b1, w2, b2, w3, b3, w4, b4, wtheta = params
    h = jnp.maximum(x @ w1 + b1, 0.0)
    h = jnp.maximum(h @ w2 + b2, 0.0)
    h = jnp.maximum(h @ w3 + b3, 0.0)
    h = jnp.maximum(h @ w4 + b4, 0.0)
    theta = h @ wtheta
    return theta @ S_backcast, theta @ S_forecast


if __name__ == "__main__":
    # Small, module-consistent shapes; tile_b=8 so the batch grid has 3 steps.
    batch = 24
    backcast_length = 16
    forecast_length = 8
    units = 32
    thetas_dim = forecast_length  # nb_harmonics=None -> thetas_dim = forecast_length
    min_period = 1

    key = jax.random.PRNGKey(0)
    kx, kp = jax.random.split(key)

    x = jax.random.normal(kx, (batch, backcast_length), dtype=jnp.float32)
    params = init_params(kp, backcast_length, units, thetas_dim)
    S_backcast, S_forecast = make_seasonal_basis(
        backcast_length, forecast_length, thetas_dim, min_period
    )

    backcast, forecast = nbeats_seasonal_forward(
        x, params, S_backcast, S_forecast, tile_b=8
    )
    jax.block_until_ready((backcast, forecast))

    # correctness check against pure-JAX reference
    ref_b, ref_f = reference_forward(x, params, S_backcast, S_forecast)
    assert backcast.shape == (batch, backcast_length)
    assert forecast.shape == (batch, forecast_length)
    np.testing.assert_allclose(np.asarray(backcast), np.asarray(ref_b), rtol=1e-5, atol=1e-5)
    np.testing.assert_allclose(np.asarray(forecast), np.asarray(ref_f), rtol=1e-5, atol=1e-5)

    print("KERNEL_OK")
</pallas_src>

<mosaic_0001>
module attributes {stable_mosaic.version = 11 : i64} {
  func.func @nbeats_seasonal_kernel(%arg0: i32, %arg1: memref<8x128xf32, #tpu.memory_space<vmem>>, %arg2: memref<128x128xf32, #tpu.memory_space<vmem>>, %arg3: memref<1x128xf32, #tpu.memory_space<vmem>>, %arg4: memref<128x128xf32, #tpu.memory_space<vmem>>, %arg5: memref<1x128xf32, #tpu.memory_space<vmem>>, %arg6: memref<128x128xf32, #tpu.memory_space<vmem>>, %arg7: memref<1x128xf32, #tpu.memory_space<vmem>>, %arg8: memref<128x128xf32, #tpu.memory_space<vmem>>, %arg9: memref<1x128xf32, #tpu.memory_space<vmem>>, %arg10: memref<128x128xf32, #tpu.memory_space<vmem>>, %arg11: memref<8x128xf32, #tpu.memory_space<vmem>>) attributes {dimension_semantics = [#tpu.dimension_semantics<parallel>], iteration_bounds = array<i64: 3>, scalar_prefetch = 0 : i64, scratch_operands = 0 : i64, tpu.core_type = #tpu.core_type<tc>, window_params = [{transform_indices = @transform_0, window_bounds = array<i64: 8, 128>}, {pipeline_mode = #tpu.pipeline_mode<synchronous>, transform_indices = @transform_1, window_bounds = array<i64: 128, 128>}, {pipeline_mode = #tpu.pipeline_mode<synchronous>, transform_indices = @transform_2, window_bounds = array<i64: 1, 128>}, {pipeline_mode = #tpu.pipeline_mode<synchronous>, transform_indices = @transform_3, window_bounds = array<i64: 128, 128>}, {pipeline_mode = #tpu.pipeline_mode<synchronous>, transform_indices = @transform_4, window_bounds = array<i64: 1, 128>}, {pipeline_mode = #tpu.pipeline_mode<synchronous>, transform_indices = @transform_5, window_bounds = array<i64: 128, 128>}, {pipeline_mode = #tpu.pipeline_mode<synchronous>, transform_indices = @transform_6, window_bounds = array<i64: 1, 128>}, {pipeline_mode = #tpu.pipeline_mode<synchronous>, transform_indices = @transform_7, window_bounds = array<i64: 128, 128>}, {pipeline_mode = #tpu.pipeline_mode<synchronous>, transform_indices = @transform_8, window_bounds = array<i64: 1, 128>}, {pipeline_mode = #tpu.pipeline_mode<synchronous>, transform_indices = @transform_9, window_bounds = array<i64: 128, 128>}, {transform_indices = @transform_10, window_bounds = array<i64: 8, 128>}]} {
    %c0 = arith.constant 0 : index
    %c0_0 = arith.constant 0 : index
    %0 = vector.load %arg1[%c0, %c0_0] : memref<8x128xf32, #tpu.memory_space<vmem>>, vector<8x128xf32>
    %c0_1 = arith.constant 0 : index
    %c0_2 = arith.constant 0 : index
    %1 = vector.load %arg2[%c0_1, %c0_2] : memref<128x128xf32, #tpu.memory_space<vmem>>, vector<128x128xf32>
    %cst = arith.constant dense<0.000000e+00> : vector<8x128xf32>
    %2 = tpu.matmul %0, %1, %cst {dimension_numbers = #tpu.dot_dimension_numbers<[1], [0], [0], [1], [0, 0, 1, 1], [], []>} : vector<8x128xf32>, vector<128x128xf32>, vector<8x128xf32> -> vector<8x128xf32>
    %c0_3 = arith.constant 0 : index
    %c0_4 = arith.constant 0 : index
    %3 = vector.load %arg3[%c0_3, %c0_4] : memref<1x128xf32, #tpu.memory_space<vmem>>, vector<1x128xf32>
    %4 = vector.broadcast %3 : vector<1x128xf32> to vector<8x128xf32>
    %5 = arith.addf %2, %4 : vector<8x128xf32>
    %cst_5 = arith.constant 0.000000e+00 : f32
    %6 = vector.broadcast %cst_5 : f32 to vector<8x128xf32>
    %7 = arith.maximumf %5, %6 : vector<8x128xf32>
    %c0_6 = arith.constant 0 : index
    %c0_7 = arith.constant 0 : index
    %8 = vector.load %arg4[%c0_6, %c0_7] : memref<128x128xf32, #tpu.memory_space<vmem>>, vector<128x128xf32>
    %cst_8 = arith.constant dense<0.000000e+00> : vector<8x128xf32>
    %9 = tpu.matmul %7, %8, %cst_8 {dimension_numbers = #tpu.dot_dimension_numbers<[1], [0], [0], [1], [0, 0, 1, 1], [], []>} : vector<8x128xf32>, vector<128x128xf32>, vector<8x128xf32> -> vector<8x128xf32>
    %c0_9 = arith.constant 0 : index
    %c0_10 = arith.constant 0 : index
    %10 = vector.load %arg5[%c0_9, %c0_10] : memref<1x128xf32, #tpu.memory_space<vmem>>, vector<1x128xf32>
    %11 = vector.broadcast %10 : vector<1x128xf32> to vector<8x128xf32>
    %12 = arith.addf %9, %11 : vector<8x128xf32>
    %cst_11 = arith.constant 0.000000e+00 : f32
    %13 = vector.broadcast %cst_11 : f32 to vector<8x128xf32>
    %14 = arith.maximumf %12, %13 : vector<8x128xf32>
    %c0_12 = arith.constant 0 : index
    %c0_13 = arith.constant 0 : index
    %15 = vector.load %arg6[%c0_12, %c0_13] : memref<128x128xf32, #tpu.memory_space<vmem>>, vector<128x128xf32>
    %cst_14 = arith.constant dense<0.000000e+00> : vector<8x128xf32>
    %16 = tpu.matmul %14, %15, %cst_14 {dimension_numbers = #tpu.dot_dimension_numbers<[1], [0], [0], [1], [0, 0, 1, 1], [], []>} : vector<8x128xf32>, vector<128x128xf32>, vector<8x128xf32> -> vector<8x128xf32>
    %c0_15 = arith.constant 0 : index
    %c0_16 = arith.constant 0 : index
    %17 = vector.load %arg7[%c0_15, %c0_16] : memref<1x128xf32, #tpu.memory_space<vmem>>, vector<1x128xf32>
    %18 = vector.broadcast %17 : vector<1x128xf32> to vector<8x128xf32>
    %19 = arith.addf %16, %18 : vector<8x128xf32>
    %cst_17 = arith.constant 0.000000e+00 : f32
    %20 = vector.broadcast %cst_17 : f32 to vector<8x128xf32>
    %21 = arith.maximumf %19, %20 : vector<8x128xf32>
    %c0_18 = arith.constant 0 : index
    %c0_19 = arith.constant 0 : index
    %22 = vector.load %arg8[%c0_18, %c0_19] : memref<128x128xf32, #tpu.memory_space<vmem>>, vector<128x128xf32>
    %cst_20 = arith.constant dense<0.000000e+00> : vector<8x128xf32>
    %23 = tpu.matmul %21, %22, %cst_20 {dimension_numbers = #tpu.dot_dimension_numbers<[1], [0], [0], [1], [0, 0, 1, 1], [], []>} : vector<8x128xf32>, vector<128x128xf32>, vector<8x128xf32> -> vector<8x128xf32>
    %c0_21 = arith.constant 0 : index
    %c0_22 = arith.constant 0 : index
    %24 = vector.load %arg9[%c0_21, %c0_22] : memref<1x128xf32, #tpu.memory_space<vmem>>, vector<1x128xf32>
    %25 = vector.broadcast %24 : vector<1x128xf32> to vector<8x128xf32>
    %26 = arith.addf %23, %25 : vector<8x128xf32>
    %cst_23 = arith.constant 0.000000e+00 : f32
    %27 = vector.broadcast %cst_23 : f32 to vector<8x128xf32>
    %28 = arith.maximumf %26, %27 : vector<8x128xf32>
    %c0_24 = arith.constant 0 : index
    %c0_25 = arith.constant 0 : index
    %29 = vector.load %arg10[%c0_24, %c0_25] : memref<128x128xf32, #tpu.memory_space<vmem>>, vector<128x128xf32>
    %cst_26 = arith.constant dense<0.000000e+00> : vector<8x128xf32>
    %30 = tpu.matmul %28, %29, %cst_26 {dimension_numbers = #tpu.dot_dimension_numbers<[1], [0], [0], [1], [0, 0, 1, 1], [], []>} : vector<8x128xf32>, vector<128x128xf32>, vector<8x128xf32> -> vector<8x128xf32>
    %c0_27 = arith.constant 0 : index
    %c0_28 = arith.constant 0 : index
    %31 = vector.load %arg11[%c0_27, %c0_28] : memref<8x128xf32, #tpu.memory_space<vmem>>, vector<8x128xf32>
    tpu.vector_store %arg11[%c0_27, %c0_28], %30 {strides = array<i32>} : memref<8x128xf32, #tpu.memory_space<vmem>>, vector<8x128xf32>,
    return
  }
  func.func @transform_0(%arg0: i32) -> (i32, i32) {
    %c0_i32 = arith.constant 0 : i32
    %c0_i32_0 = arith.constant 0 : i32
    return %arg0, %c0_i32 : i32, i32
  }
  func.func @transform_1(%arg0: i32) -> (i32, i32) {
    %c0_i32 = arith.constant 0 : i32
    %c0_i32_0 = arith.constant 0 : i32
    %c0_i32_1 = arith.constant 0 : i32
    return %c0_i32, %c0_i32_0 : i32, i32
  }
  func.func @transform_2(%arg0: i32) -> (i32, i32) {
    %c0_i32 = arith.constant 0 : i32
    %c0_i32_0 = arith.constant 0 : i32
    %c0_i32_1 = arith.constant 0 : i32
    return %c0_i32, %c0_i32_0 : i32, i32
  }
  func.func @transform_3(%arg0: i32) -> (i32, i32) {
    %c0_i32 = arith.constant 0 : i32
    %c0_i32_0 = arith.constant 0 : i32
    %c0_i32_1 = arith.constant 0 : i32
    return %c0_i32, %c0_i32_0 : i32, i32
  }
  func.func @transform_4(%arg0: i32) -> (i32, i32) {
    %c0_i32 = arith.constant 0 : i32
    %c0_i32_0 = arith.constant 0 : i32
    %c0_i32_1 = arith.constant 0 : i32
    return %c0_i32, %c0_i32_0 : i32, i32
  }
  func.func @transform_5(%arg0: i32) -> (i32, i32) {
    %c0_i32 = arith.constant 0 : i32
    %c0_i32_0 = arith.constant 0 : i32
    %c0_i32_1 = arith.constant 0 : i32
    return %c0_i32, %c0_i32_0 : i32, i32
  }
  func.func @transform_6(%arg0: i32) -> (i32, i32) {
    %c0_i32 = arith.constant 0 : i32
    %c0_i32_0 = arith.constant 0 : i32
    %c0_i32_1 = arith.constant 0 : i32
    return %c0_i32, %c0_i32_0 : i32, i32
  }
  func.func @transform_7(%arg0: i32) -> (i32, i32) {
    %c0_i32 = arith.constant 0 : i32
    %c0_i32_0 = arith.constant 0 : i32
    %c0_i32_1 = arith.constant 0 : i32
    return %c0_i32, %c0_i32_0 : i32, i32
  }
  func.func @transform_8(%arg0: i32) -> (i32, i32) {
    %c0_i32 = arith.constant 0 : i32
    %c0_i32_0 = arith.constant 0 : i32
    %c0_i32_1 = arith.constant 0 : i32
    return %c0_i32, %c0_i32_0 : i32, i32
  }
  func.func @transform_9(%arg0: i32) -> (i32, i32) {
    %c0_i32 = arith.constant 0 : i32
    %c0_i32_0 = arith.constant 0 : i32
    %c0_i32_1 = arith.constant 0 : i32
    return %c0_i32, %c0_i32_0 : i32, i32
  }
  func.func @transform_10(%arg0: i32) -> (i32, i32) {
    %c0_i32 = arith.constant 0 : i32
    %c0_i32_0 = arith.constant 0 : i32
    return %arg0, %c0_i32 : i32, i32
  }
}

</mosaic_0001>

<bundles_post_ra>
// kernel: tpu_custom_call.1
= control target key start
LH: loop header
LB: loop body
LE: loop exit
PB: predicated region body
PF: predicated region fallthrough
CT: control target
= control target key end

     0   :  { %s2075_s0 = inlined_call_operand.hbm [shape: f32[24,128], index: 0, kind: input, shape index: {}]   ;;  %s2076_s1 = inlined_call_operand.hbm [shape: f32[128,128], index: 1, kind: input, shape index: {}]   ;;  %s2077_s2 = inlined_call_operand.vmem [shape: f32[1,128], index: 2, kind: input, shape index: {}]   ;;  %s2078_s3 = inlined_call_operand.hbm [shape: f32[128,128], index: 3, kind: input, shape index: {}]   ;;  %s2079_s4 = inlined_call_operand.vmem [shape: f32[1,128], index: 4, kind: input, shape index: {}]   ;;  %s2080_s5 = inlined_call_operand.hbm [shape: f32[128,128], index: 5, kind: input, shape index: {}]   ;;  %s2081_s6 = inlined_call_operand.vmem [shape: f32[1,128], index: 6, kind: input, shape index: {}]   ;;  %s2082_s7 = inlined_call_operand.hbm [shape: f32[128,128], index: 7, kind: input, shape index: {}]   ;;  %s2083_s8 = inlined_call_operand.vmem [shape: f32[1,128], index: 8, kind: input, shape index: {}]   ;;  %s2084_s9 = inlined_call_operand.hbm [shape: f32[128,128], index: 9, kind: input, shape index: {}]   ;;  %s2085_s10 = inlined_call_operand.hbm [shape: f32[24,128], index: 10, kind: output, shape index: {}]  }
   0x1   :  { %2090 = sst [smem:[#allocation19_spill]] %s2076_s1 }
   0x2   :  { %2091 = sst [smem:[#allocation20_spill]] %s2078_s3 }
   0x3   :  { %2092 = sst [smem:[#allocation21_spill]] %s2080_s5 }
   0x4   :  { %2093 = sst [smem:[#allocation22_spill]] %s2082_s7 }
   0x5   :  { %2094 = sst [smem:[#allocation23_spill]] %s2084_s9 }
   0x6   :  { %15 = vsyncpa [#allocation3], 0 }
   0x7   :  { %17 = vsyncpa [#allocation3 + $0x1], 0 }
   0x8   :  { %18 = vsyncpa [#allocation6], 0 }
   0x9   :  { %19 = vsyncpa [#allocation9], 0 }
   0xa   :  { %20 = vsyncpa [#allocation12], 0 }
   0xb   :  { %21 = vsyncpa [#allocation4], 0 }
   0xc   :  { %23 = vsyncpa [#allocation4 + $0x1], 0  ;;  %s1733_s13 = smov 0   ;;  %s1735_s14 = smov 0  }
   0xd   :  { %s1737_s15 = smov 0   ;;  %s1739_s16 = smov 0  }
   0xe LB: > { %s1667_s17 = smov [#allocation5]   ;;  %s1754_s19 = sadd.s32 4294967295, %s1665_s16   ;;  %s1665_s16 = sphi %s1739_s16, %s2120_s16   ;;  %s1661_s15 = sphi %s1737_s15, %s2119_s15   ;;  %s1657_s14 = sphi %s1735_s14, %s2118_s14   ;;  %s1653_s13 = sphi %s1733_s13, %s2117_s13  }
   0xf   : > { %s287_s18 = sshll.u32 %s1667_s17, 4  ;;  %p1045_p0 = scmp.ge.s32.totalorder %s1665_s16, 1  ;;  %s288_s18 = int_to_ptr.vmem [resolvable:$true] %s287_s18 }
  0x10   : > { %p2086_p1 = scmp.eq.s32.totalorder %s1754_s19, 0  ;;  %p275_p2 = scmp.lt.s32.totalorder %s1665_s16, 4 }
  0x11   : > { %s1668_s21 = smov [#allocation8]   ;;  %s1669_s24 = smov [#allocation7]  }
  0x12   : > { %p1759_p3 = pnand %p1045_p0, %p275_p2  ;;  %s319_s22 = sshll.u32 %s1668_s21, 4  ;;  %s1771_s22 = int_to_ptr.vmem [resolvable:$true] %s319_s22 }
  0x13   : > { %s303_s25 = sshll.u32 %s1669_s24, 4  ;;  %s1442_s27 = scalar_lea.vmem %s288_s18, 2048  ;;  %s1773_s25 = int_to_ptr.vmem [resolvable:$true] %s303_s25 }
  0x14   : > { %s2095_s20 = scalar_select %p1759_p3, 1, 0 }
  0x15   : > { %p1354_p4 = pneg %p1759_p3  ;;  %p1443_p7 = scmp.ne.s32.totalorder %s288_s18, %s1442_s27 }
  0x16   : > { %p1450_p10 = scmp.lt.s32.totalorder %s288_s18, %s288_s18  ;;  %p1451_p11 = scmp.lt.s32.totalorder %s1442_s27, %s1442_s27 }
  0x17   : > { %p1767_p5 = pnand %p1354_p4, %p2086_p1 }
  0x18   : > { %p1452_p12 = por %p1451_p11, %p1450_p10 }
  0x19   : > { %p1777_p6 = pneg %p1767_p5 }
  0x1b   : > { %p1445_p8 = pnand %p1443_p7, %p1777_p6 }
  0x1d   : > { %p1446_p9 = pneg %p1445_p8 }
  0x1f   : > { %p1453_p13 = pnand %p1452_p12, %p1446_p9 }
  0x21   : > { %1456 = shalt.err (!%p1453_p13)
}
  0x22   : > { %s1670_s28 = smov 128   ;;  %s1671_s29 = smov 8  }
  0x23   : > { %s2098_s1 = sld [smem:[#allocation19_spill]]  ;;  %s1468_s12 = scalar_lea.vmem %s1771_s22, 2048 }
  0x24   : > { %p1469_p0 = scmp.ne.s32.totalorder %s1771_s22, %s1468_s12  ;;  %p1476_p7 = scmp.lt.s32.totalorder %s1771_s22, %s1771_s22 }
  0x25   : > { %p1477_p8 = scmp.lt.s32.totalorder %s1468_s12, %s1468_s12 }
  0x26   : > { %p1471_p2 = pnand %p1469_p0, %p1777_p6 }
  0x27   : > { %p1478_p9 = por %p1477_p8, %p1476_p7 }
  0x28   : > { %p1472_p4 = pneg %p1471_p2 }
  0x29   : > { %1357 = dma.hbm_to_vmem [thread:$0]  (!%p1767_p5), %s2098_s1, 2048, %s288_s18, [#allocation6], %s1670_s28, %s1670_s28, %s1671_s29  }
  0x2a   : > { %p1479_p10 = pnand %p1478_p9, %p1472_p4 }
  0x2c   : > { %1482 = shalt.err (!%p1479_p10)
}
  0x2d   : > { %s2099_s5 = sld [smem:[#allocation21_spill]]  ;;  %s1494_s18 = scalar_lea.vmem %s1773_s25, 2048 }
  0x2e   : > { %p1495_p11 = scmp.ne.s32.totalorder %s1773_s25, %s1494_s18  ;;  %p1502_p0 = scmp.lt.s32.totalorder %s1773_s25, %s1773_s25 }
  0x2f   : > { %p1503_p2 = scmp.lt.s32.totalorder %s1494_s18, %s1494_s18 }
  0x30   : > { %p1497_p12 = pnand %p1495_p11, %p1777_p6 }
  0x31   : > { %p1504_p4 = por %p1503_p2, %p1502_p0 }
  0x32   : > { %p1498_p13 = pneg %p1497_p12 }
  0x33   : > { %1363 = dma.hbm_to_vmem [thread:$0]  (!%p1767_p5), %s2099_s5, 2048, %s1771_s22, [#allocation9], %s1670_s28, %s1670_s28, %s1671_s29  }
  0x34   : > { %p1505_p7 = pnand %p1504_p4, %p1498_p13 }
  0x36   : > { %1508 = shalt.err (!%p1505_p7)
}
  0x37   : > { %s2100_s3 = sld [smem:[#allocation20_spill]]  ;;  %s1672_s22 = smov [#allocation10]  }
  0x38   : > { %s335_s30 = sshll.u32 %s1672_s22, 4  ;;  %s1673_s11 = smov [#allocation11]   ;;  %s336_s30 = int_to_ptr.vmem [resolvable:$true] %s335_s30 }
  0x39   : > { %s351_s12 = sshll.u32 %s1673_s11, 4  ;;  %s1520_s17 = scalar_lea.vmem %s336_s30, 2048  ;;  %s352_s12 = int_to_ptr.vmem [resolvable:$true] %s351_s12 }
  0x3a   : > { %p1521_p8 = scmp.ne.s32.totalorder %s336_s30, %s1520_s17  ;;  %p1528_p11 = scmp.lt.s32.totalorder %s336_s30, %s336_s30 }
  0x3b   : > { %p1529_p12 = scmp.lt.s32.totalorder %s1520_s17, %s1520_s17 }
  0x3c   : > { %p1523_p9 = pnand %p1521_p8, %p1777_p6 }
  0x3d   : > { %1360 = dma.hbm_to_vmem [thread:$0]  (!%p1767_p5), %s2100_s3, 2048, %s1773_s25, [#allocation6], %s1670_s28, %s1670_s28, %s1671_s29  }
  0x3e   : > { %p1524_p10 = pneg %p1523_p9  ;;  %p1530_p13 = por %p1529_p12, %p1528_p11 }
  0x40   : > { %p1531_p0 = pnand %p1530_p13, %p1524_p10 }
  0x42   : > { %1534 = shalt.err (!%p1531_p0)
}
  0x43   : > { %s2101_s7 = sld [smem:[#allocation22_spill]]  ;;  %s1546_s18 = scalar_lea.vmem %s352_s12, 2048 }
  0x44   : > { %p1547_p2 = scmp.ne.s32.totalorder %s352_s12, %s1546_s18  ;;  %p1554_p8 = scmp.lt.s32.totalorder %s352_s12, %s352_s12 }
  0x45   : > { %p1555_p9 = scmp.lt.s32.totalorder %s1546_s18, %s1546_s18 }
  0x46   : > { %p1549_p4 = pnand %p1547_p2, %p1777_p6 }
  0x47   : > { %p1556_p10 = por %p1555_p9, %p1554_p8 }
  0x48   : > { %p1550_p7 = pneg %p1549_p4 }
  0x49   : > { %1366 = dma.hbm_to_vmem [thread:$0]  (!%p1767_p5), %s2101_s7, 2048, %s336_s30, [#allocation9], %s1670_s28, %s1670_s28, %s1671_s29  }
  0x4a   : > { %p1557_p11 = pnand %p1556_p10, %p1550_p7 }
  0x4c   : > { %1560 = shalt.err (!%p1557_p11)
}
  0x4d   : > { %s2102_s9 = sld [smem:[#allocation23_spill]]  ;;  %s1044_s23 = sadd.s32 4294967294, %s1665_s16  }
  0x4e   : > { %s1843_s26 = sadd.s32 1, %s1665_s16   ;;  %s36_s22 = sadd.s32 1, %s1661_s15 }
  0x4f   : > { %s33_s30 = ssub.s32 %s1665_s16, %s1843_s26  ;;  %p43_p6 = scmp.ne.s32.totalorder %s1661_s15, %s1657_s14 }
  0x50   : > { %p34_p12 = scmp.eq.s32.totalorder %s33_s30, 0  ;;  %p44_p13 = scmp.eq.s32.totalorder %s1665_s16, 0 }
  0x51   : > { %p49_p0 = scmp.ne.s32.totalorder %s1657_s14, %s1653_s13  ;;  %p262_p2 = scmp.eq.s32.totalorder %s1754_s19, 2 }
  0x52   : > { %s1855_s11 = scalar_select %p34_p12, %s1661_s15, %s36_s22  }
  0x53   : > { %1369 = dma.hbm_to_vmem [thread:$0]  (!%p1767_p5), %s2102_s9, 2048, %s352_s12, [#allocation12], %s1670_s28, %s1670_s28, %s1671_s29  }
  0x54   : > { %p45_p4 = por %p44_p13, %p43_p6  ;;  %p1859_p7 = por %p2086_p1, %p49_p0 }
  0x55   : > { %p1863_p5 = por %p262_p2, %p43_p6  ;;  %p268_p8 = scmp.eq.s32.totalorder %s1044_s23, 2 }
  0x56   : > { %s2103_s17 = scalar_select %p1859_p7, 1, 0 }
  0x57   : > { %s2104_s28 = scalar_select %p1863_p5, 1, 0 }
  0x58   : > { %p1383_p9 = scmp.lt.s32.totalorder %s1665_s16, 3  ;;  %s365_s29 = sand.u32 1, %s1661_s15  }
  0x59   : > { %p1869_p10 = por %p268_p8, %p49_p0  ;;  %s1052_s25 = sshll.u32 %s365_s29, 3 }
  0x5a   : > { %s1053_s21 = sshll.u32 %s1665_s16, 7  ;;  %s369_s22 = scalar_lea.vmem [#allocation2], %s1052_s25 }
  0x5b   : > { %s2105_s12 = scalar_select %p1869_p10, 1, 0 }
  0x5c   : > { %s1877_s27 = scalar_lea.hbm %s2075_s0, %s1053_s21  ;;  %s376_s30 = sshll.u32 %s369_s22, 4  ;;  %s377_s30 = int_to_ptr.vmem [resolvable:$true] %s376_s30 }
  0x5d   : > { %p1879_p11 = pnand %p1383_p9, %p45_p4  ;;  %s366_s1 = scalar_lea.sflag [#allocation3], %s365_s29 }
  0x5e   : > { %s1561_s3 = scalar_lea.hbm %s1877_s27, 128  ;;  %s1566_s24 = scalar_lea.hbm %s2075_s0, 384 }
  0x5f   : > { %p1562_p6 = scmp.ne.s32.totalorder %s1877_s27, %s1561_s3  ;;  %p1563_p12 = pneg %p1879_p11 }
  0x60   : > { %p1567_p2 = scmp.lt.s32.totalorder %s1877_s27, %s2075_s0  ;;  %p1568_p4 = scmp.lt.s32.totalorder %s1566_s24, %s1561_s3 }
  0x61   : > { %p1564_p13 = pnand %p1563_p12, %p1562_p6 }
  0x62   : > { %p1569_p8 = por %p1568_p4, %p1567_p2 }
  0x63   : > { %p1565_p0 = pneg %p1564_p13 }
  0x65   : > { %p1570_p9 = pnand %p1569_p8, %p1565_p0 }
  0x67   : > { %1573 = shalt.err (!%p1570_p9)
}
  0x68   : > { %s1574_s22 = scalar_lea.vmem %s377_s30, 128  ;;  %s1674_s29 = smov [#allocation2]  }
  0x69   : > { %p1575_p1 = scmp.ne.s32.totalorder %s377_s30, %s1574_s22  ;;  %s1579_s7 = sshll.u32 %s1674_s29, 4  ;;  %s1580_s7 = int_to_ptr.vmem [resolvable:$false] %s1579_s7 }
  0x6a   : > { %s1581_s9 = scalar_lea.vmem %s1580_s7, 256  ;;  %p1582_p6 = scmp.lt.s32.totalorder %s377_s30, %s1580_s7 }
  0x6b   : > { %p1577_p10 = pnand %p1575_p1, %p1563_p12  ;;  %p1583_p13 = scmp.lt.s32.totalorder %s1581_s9, %s1574_s22 }
  0x6d   : > { %p1578_p5 = pneg %p1577_p10  ;;  %p1584_p7 = por %p1583_p13, %p1582_p6 }
  0x6f   : > { %p1585_p3 = pnand %p1584_p7, %p1578_p5 }
  0x71   : > { %1588 = shalt.err (!%p1585_p3)
}
  0x72   : > { %1373 = dma.hbm_to_vmem [thread:$0]  (!%p1879_p11), %s1877_s27, 128, %s377_s30, %s366_s1  }
  0x73   : > { %p2107_p0 = scmp.ne.s32.totalorder %s2095_s20, 0 }
  0x74   : > { %s1900_s3 = sand.u32 (!%p2107_p0), 1, %s1657_s14   ;;  %p2108_p1 = scmp.ne.s32.totalorder (!%p2107_p0), %s2103_s17, 0 }
  0x75   : > { %385 = sbr.rel (%p2107_p0) target bundleno = 1161 (0x489), region = 60  ;;  %s1055_s5 = sshll.u32 (!%p2107_p0), %s1900_s3, 3 }
  0x76   : > { %s388_s7 = scalar_lea.sflag (!%p2107_p0), [#allocation3], %s1900_s3  ;;  %s1906_s9 = scalar_lea.vmem (!%p2107_p0), [#allocation2], %s1055_s5 }
  0x7a   : > { %1632 = dma.done.wait (%p2108_p1), %s388_s7, 128  }
  0x7b   : > { %1634 = vsyncadd (%p2108_p1), %s388_s7, 4294967168  ;;  %p2109_p3 = scmp.eq.s32.totalorder %s1754_s19, 0 }
  0x7d   : > { %1636 = dma.done.wait (%p2109_p3), [#allocation6], 4096   ;;  %p2110_p7 = pmov %p2109_p3 }
  0x7e   : > { %p2111_p5 = pmov %p2109_p3 }
  0x7f   : > { %1638 = vsyncadd (%p2110_p7), [#allocation6], 4294963200 }
  0x80   : > { %1640 = dma.done.wait (%p2111_p5), [#allocation9], 4096   ;;  %p2112_p10 = pmov %p2109_p3 }
  0x81   : > { %p2113_p11 = pmov %p2109_p3 }
  0x82   : > { %1642 = vsyncadd (%p2112_p10), [#allocation9], 4294963200 }
  0x83   : > { %1644 = dma.done.wait (%p2113_p11), [#allocation12], 2048   ;;  %p2114_p12 = pmov %p2109_p3 }
  0x84   : > { %v1675_v0 = vmov 0.0   ;;  %vm1676_vm0 = vmmov 0   ;;  %v464_v1 = vld [vmem:[#allocation5 + $0x78] sm:$0xff]  ;;  %v463_v2 = vld [vmem:[#allocation5 + $0x70] sm:$0xff]  ;;  %v462_v3 = vld [vmem:[#allocation5 + $0x68] sm:$0xff]  ;;  %s447_s24 = scalar_lea.vmem [#allocation13], %s1055_s5 }
  0x85   : > { %1646 = vsyncadd (%p2114_p12), [#allocation12], 4294965248  ;;  %1155 = vmatprep.subr.mxu0 %v1675_v0  ;;  %1187 = vmatprep.mubr.msk.f32.mxu0 %vm1676_vm0, %v1675_v0  ;;  %v461_v4 = vld [vmem:[#allocation5 + $0x60] sm:$0xff]  ;;  %v558_v5 = vld [vmem:[#allocation7 + $0x78] sm:$0xff]  ;;  %s926_s25 = sshll.u32 %s447_s24, 4  ;;  %s1067_s22 = sshll.u32 %s1754_s19, 7  ;;  %s2030_s25 = int_to_ptr.vmem [resolvable:$true] %s926_s25 }
  0x86   : > { %1190 = vmatprep.subr.mxu1 %v1675_v0  ;;  %1222 = vmatprep.mubr.msk.f32.mxu1 %vm1676_vm0, %v1675_v0  ;;  %v460_v6 = vld [vmem:[#allocation5 + $0x58] sm:$0xff]  ;;  %v557_v7 = vld [vmem:[#allocation7 + $0x70] sm:$0xff]  ;;  %v556_v8 = vld [vmem:[#allocation7 + $0x68] sm:$0xff]  ;;  %s913_s1 = scalar_lea.sflag [#allocation4], %s1900_s3  ;;  %s1589_s20 = scalar_lea.vmem %s2030_s25, 128 }
  0x87   : > { %1156 = vmatpush3.msra.mxu0 %v464_v1  ;;  %1191 = vmatpush3.msra.mxu1 %v558_v5  ;;  %v459_v9 = vld [vmem:[#allocation5 + $0x50] sm:$0xff]  ;;  %v555_v10 = vld [vmem:[#allocation7 + $0x60] sm:$0xff]  ;;  %v458_v11 = vld [vmem:[#allocation5 + $0x48] sm:$0xff]  ;;  %p1590_p2 = scmp.ne.s32.totalorder %s2030_s25, %s1589_s20  ;;  %p2115_p4 = scmp.ne.s32.totalorder %s2104_s28, 0 }
  0x88   : > { %1157 = vmatprep.subr.mxu0 %v1675_v0  ;;  %1192 = vmatprep.subr.mxu1 %v1675_v0  ;;  %v554_v12 = vld [vmem:[#allocation7 + $0x58] sm:$0xff]  ;;  %v457_v13 = vld [vmem:[#allocation5 + $0x40] sm:$0xff]  ;;  %v553_v14 = vld [vmem:[#allocation7 + $0x50] sm:$0xff]  ;;  %s1677_s19 = smov [#allocation13]  }
  0x89   : > { %1158 = vmatpush3.msra.mxu0 %v463_v2  ;;  %1193 = vmatpush3.msra.mxu1 %v557_v7  ;;  %v456_v15 = vld [vmem:[#allocation5 + $0x38] sm:$0xff]  ;;  %v552_v16 = vld [vmem:[#allocation7 + $0x48] sm:$0xff]  ;;  %v455_v17 = vld [vmem:[#allocation5 + $0x30] sm:$0xff]  ;;  %p1591_p8 = pnand %p1590_p2, %p2115_p4  ;;  %s1593_s5 = sshll.u32 %s1677_s19, 4  ;;  %s1594_s5 = int_to_ptr.vmem [resolvable:$false] %s1593_s5 }
  0x8a   : > { %1159 = vmatprep.subr.mxu0 %v1675_v0  ;;  %1194 = vmatprep.subr.mxu1 %v1675_v0  ;;  %v551_v18 = vld [vmem:[#allocation7 + $0x40] sm:$0xff]  ;;  %v454_v19 = vld [vmem:[#allocation5 + $0x28] sm:$0xff]  ;;  %v550_v20 = vld [vmem:[#allocation7 + $0x38] sm:$0xff]  ;;  %s1595_s17 = scalar_lea.vmem %s1594_s5, 256  ;;  %p1596_p6 = scmp.lt.s32.totalorder %s2030_s25, %s1594_s5 }
  0x8b   : > { %1160 = vmatpush3.msra.mxu0 %v462_v3  ;;  %1195 = vmatpush3.msra.mxu1 %v556_v8  ;;  %v453_v21 = vld [vmem:[#allocation5 + $0x20] sm:$0xff]  ;;  %v549_v22 = vld [vmem:[#allocation7 + $0x30] sm:$0xff]  ;;  %v452_v23 = vld [vmem:[#allocation5 + $0x18] sm:$0xff]  ;;  %p1592_p9 = pneg %p1591_p8  ;;  %p1597_p13 = scmp.lt.s32.totalorder %s1595_s17, %s1589_s20 }
  0x8c   : > { %1161 = vmatprep.subr.mxu0 %v1675_v0  ;;  %1196 = vmatprep.subr.mxu1 %v1675_v0  ;;  %v548_v24 = vld [vmem:[#allocation7 + $0x28] sm:$0xff]  ;;  %v451_v25 = vld [vmem:[#allocation5 + $0x10] sm:$0xff]  ;;  %v547_v26 = vld [vmem:[#allocation7 + $0x20] sm:$0xff] }
  0x8d   : > { %1162 = vmatpush3.msra.mxu0 %v461_v4  ;;  %1197 = vmatpush3.msra.mxu1 %v555_v10  ;;  %v450_v27 = vld [vmem:[#allocation5 + $0x8] sm:$0xff]  ;;  %v546_v28 = vld [vmem:[#allocation7 + $0x18] sm:$0xff]  ;;  %v449_v29 = vld [vmem:[#allocation5] sm:$0xff]  ;;  %p1598_p0 = por %p1597_p13, %p1596_p6 }
  0x8e   : > { %1163 = vmatprep.subr.mxu0 %v1675_v0  ;;  %1198 = vmatprep.subr.mxu1 %v1675_v0  ;;  %v448_v30 = vld [vmem:[%s1906_s9] sm:$0xff]  ;;  %v544_v32 = vld [vmem:[#allocation7 + $0x8] sm:$0xff]  ;;  %v543_v33 = vld [vmem:[#allocation7] sm:$0xff]  ;;  %s2035_s9 = scalar_lea.hbm %s2085_s10, %s1067_s22 }
  0x8f   : > { %1164 = vmatpush3.msra.mxu0 %v460_v6  ;;  %1199 = vmatpush3.msra.mxu1 %v554_v12  ;;  %v545_v31 = vld [vmem:[#allocation7 + $0x10] sm:$0xff]  ;;  %v652_v34 = vld [vmem:[#allocation8 + $0x78] sm:$0xff]  ;;  %v650_v36 = vld [vmem:[#allocation8 + $0x68] sm:$0xff]  ;;  %p1599_p1 = pnand %p1598_p0, %p1592_p9 }
  0x90   : > { %1165 = vmatprep.subr.mxu0 %v1675_v0  ;;  %1200 = vmatprep.subr.mxu1 %v1675_v0  ;;  %v651_v35 = vld [vmem:[#allocation8 + $0x70] sm:$0xff]  ;;  %v649_v37 = vld [vmem:[#allocation8 + $0x60] sm:$0xff]  ;;  %v648_v38 = vld [vmem:[#allocation8 + $0x58] sm:$0xff] }
  0x91   : > { %1166 = vmatpush3.msra.mxu0 %v459_v9  ;;  %1201 = vmatpush3.msra.mxu1 %v553_v14  ;;  %v647_v39 = vld [vmem:[#allocation8 + $0x50] sm:$0xff]  ;;  %v646_v40 = vld [vmem:[#allocation8 + $0x48] sm:$0xff]  ;;  %v645_v41 = vld [vmem:[#allocation8 + $0x40] sm:$0xff] }
  0x92   : > { %1167 = vmatprep.subr.mxu0 %v1675_v0  ;;  %1202 = vmatprep.subr.mxu1 %v1675_v0  ;;  %v644_v42 = vld [vmem:[#allocation8 + $0x38] sm:$0xff]  ;;  %v643_v43 = vld [vmem:[#allocation8 + $0x30] sm:$0xff]  ;;  %v642_v44 = vld [vmem:[#allocation8 + $0x28] sm:$0xff] }
  0x93   : > { %1168 = vmatpush3.msra.mxu0 %v458_v11  ;;  %1203 = vmatpush3.msra.mxu1 %v552_v16  ;;  %v641_v45 = vld [vmem:[#allocation8 + $0x20] sm:$0xff]  ;;  %v640_v46 = vld [vmem:[#allocation8 + $0x18] sm:$0xff]  ;;  %v1062_v47 = vld [vmem:[%s2077_s2] ss:$0 sm:$0xff] }
  0x94   : > { %1169 = vmatprep.subr.mxu0 %v1675_v0  ;;  %1204 = vmatprep.subr.mxu1 %v1675_v0  ;;  %v639_v52 = vld [vmem:[#allocation8 + $0x10] sm:$0xff]  ;;  %v638_v53 = vld [vmem:[#allocation8 + $0x8] sm:$0xff]  ;;  %v637_v54 = vld [vmem:[#allocation8] sm:$0xff] }
  0x95   : > { %1170 = vmatpush3.msra.mxu0 %v457_v13  ;;  %1205 = vmatpush3.msra.mxu1 %v551_v18  ;;  %v746_v55 = vld [vmem:[#allocation10 + $0x78] sm:$0xff]  ;;  %v745_v56 = vld [vmem:[#allocation10 + $0x70] sm:$0xff]  ;;  %v744_v57 = vld [vmem:[#allocation10 + $0x68] sm:$0xff] }
  0x96   : > { %1171 = vmatprep.subr.mxu0 %v1675_v0  ;;  %1206 = vmatprep.subr.mxu1 %v1675_v0  ;;  %v743_v58 = vld [vmem:[#allocation10 + $0x60] sm:$0xff]  ;;  %v742_v59 = vld [vmem:[#allocation10 + $0x58] sm:$0xff]  ;;  %v741_v60 = vld [vmem:[#allocation10 + $0x50] sm:$0xff] }
  0x97   : > { %1172 = vmatpush3.msra.mxu0 %v456_v15  ;;  %1207 = vmatpush3.msra.mxu1 %v550_v20  ;;  %v740_v61 = vld [vmem:[#allocation10 + $0x48] sm:$0xff]  ;;  %v739_v62 = vld [vmem:[#allocation10 + $0x40] sm:$0xff]  ;;  %v738_v63 = vld [vmem:[#allocation10 + $0x38] sm:$0xff] }
  0x98   : > { %1173 = vmatprep.subr.mxu0 %v1675_v0  ;;  %1208 = vmatprep.subr.mxu1 %v1675_v0  ;;  %v737_v1 = vld [vmem:[#allocation10 + $0x30] sm:$0xff]  ;;  %v736_v2 = vld [vmem:[#allocation10 + $0x28] sm:$0xff]  ;;  %v735_v3 = vld [vmem:[#allocation10 + $0x20] sm:$0xff] }
  0x99   : > { %1174 = vmatpush3.msra.mxu0 %v455_v17  ;;  %1209 = vmatpush3.msra.mxu1 %v549_v22  ;;  %v734_v4 = vld [vmem:[#allocation10 + $0x18] sm:$0xff]  ;;  %v1063_v5 = vld [vmem:[%s2079_s4] ss:$0 sm:$0xff]  ;;  %v732_v11 = vld [vmem:[#allocation10 + $0x8] sm:$0xff] }
  0x9a   : > { %1175 = vmatprep.subr.mxu0 %v1675_v0  ;;  %1210 = vmatprep.subr.mxu1 %v1675_v0  ;;  %v733_v10 = vld [vmem:[#allocation10 + $0x10] sm:$0xff]  ;;  %v731_v12 = vld [vmem:[#allocation10] sm:$0xff]  ;;  %v840_v13 = vld [vmem:[#allocation11 + $0x78] sm:$0xff] }
  0x9b   : > { %1176 = vmatpush3.msra.mxu0 %v454_v19  ;;  %1211 = vmatpush3.msra.mxu1 %v548_v24  ;;  %v839_v14 = vld [vmem:[#allocation11 + $0x70] sm:$0xff]  ;;  %v838_v15 = vld [vmem:[#allocation11 + $0x68] sm:$0xff]  ;;  %v837_v16 = vld [vmem:[#allocation11 + $0x60] sm:$0xff] }
  0x9c   : > { %1177 = vmatprep.subr.mxu0 %v1675_v0  ;;  %1212 = vmatprep.subr.mxu1 %v1675_v0  ;;  %v836_v17 = vld [vmem:[#allocation11 + $0x58] sm:$0xff]  ;;  %v835_v18 = vld [vmem:[#allocation11 + $0x50] sm:$0xff]  ;;  %v834_v19 = vld [vmem:[#allocation11 + $0x48] sm:$0xff] }
  0x9d   : > { %1178 = vmatpush3.msra.mxu0 %v453_v21  ;;  %1213 = vmatpush3.msra.mxu1 %v547_v26  ;;  %v833_v20 = vld [vmem:[#allocation11 + $0x40] sm:$0xff]  ;;  %v832_v21 = vld [vmem:[#allocation11 + $0x38] sm:$0xff]  ;;  %v831_v22 = vld [vmem:[#allocation11 + $0x30] sm:$0xff] }
  0x9e   : > { %1179 = vmatprep.subr.mxu0 %v1675_v0  ;;  %1214 = vmatprep.subr.mxu1 %v1675_v0  ;;  %v829_v24 = vld [vmem:[#allocation11 + $0x20] sm:$0xff]  ;;  %v1064_v26 = vld [vmem:[%s2081_s6] ss:$0 sm:$0xff] }
  0x9f   : > { %1180 = vmatpush3.msra.mxu0 %v452_v23  ;;  %1215 = vmatpush3.msra.mxu1 %v546_v28  ;;  %v830_v23 = vld [vmem:[#allocation11 + $0x28] sm:$0xff] }
  0xa0   : > { %1181 = vmatprep.subr.mxu0 %v1675_v0  ;;  %1216 = vmatprep.subr.mxu1 %v1675_v0 }
  0xa1   : > { %1182 = vmatpush3.msra.mxu0 %v451_v25  ;;  %1217 = vmatpush3.msra.mxu1 %v545_v31  ;;  %v828_v25 = vld [vmem:[#allocation11 + $0x18] sm:$0xff]  ;;  %v827_v31 = vld [vmem:[#allocation11 + $0x10] sm:$0xff] }
  0xa2   : > { %1183 = vmatprep.subr.mxu0 %v1675_v0  ;;  %1218 = vmatprep.subr.mxu1 %v1675_v0 }
  0xa3   : > { %1184 = vmatpush3.msra.mxu0 %v450_v27  ;;  %1219 = vmatpush3.msra.mxu1 %v544_v32  ;;  %v826_v32 = vld [vmem:[#allocation11 + $0x8] sm:$0xff] }
  0xa4   : > { %1185 = vmatprep.subr.mxu0 %v1675_v0  ;;  %1220 = vmatprep.subr.mxu1 %v1675_v0 }
  0xa5   : > { %1186 = vmatpush3.msra.mxu0 %v449_v29  ;;  %1221 = vmatpush3.msra.mxu1 %v543_v33  ;;  %v825_v33 = vld [vmem:[#allocation11] sm:$0xff] }
  0xa6   : > { %1188 = vmatmul.mubr.f32.vlgmr.msra.gmra.mxu0 %v448_v30  ;;  %1225 = vmatprep.subr.mxu0 %v1675_v0 }
  0xa7   : > { %1257 = vmatprep.mubr.msk.f32.mxu0 %vm1676_vm0, %v1675_v0  ;;  %1260 = vmatprep.subr.mxu1 %v1675_v0 }
  0xa8   : > { %1226 = vmatpush3.msra.mxu0 %v652_v34  ;;  %v1065_v34 = vld [vmem:[%s2083_s8] ss:$0 sm:$0xff] }
  0xa9   : > { %1227 = vmatprep.subr.mxu0 %v1675_v0 }
  0xaa   : > { %1228 = vmatpush3.msra.mxu0 %v651_v35 }
  0xab   : > { %1229 = vmatprep.subr.mxu0 %v1675_v0 }
  0xac   : > { %1230 = vmatpush3.msra.mxu0 %v650_v36 }
  0xad   : > { %1231 = vmatprep.subr.mxu0 %v1675_v0 }
  0xae   : > { %1232 = vmatpush3.msra.mxu0 %v649_v37 }
  0xaf   : > { %1233 = vmatprep.subr.mxu0 %v1675_v0 }
  0xb0   : > { %1234 = vmatpush3.msra.mxu0 %v648_v38 }
  0xb1   : > { %1235 = vmatprep.subr.mxu0 %v1675_v0 }
  0xb2   : > { %1236 = vmatpush3.msra.mxu0 %v647_v39 }
  0xb3   : > { %1237 = vmatprep.subr.mxu0 %v1675_v0 }
  0xb4   : > { %1238 = vmatpush3.msra.mxu0 %v646_v40 }
  0xb5   : > { %1239 = vmatprep.subr.mxu0 %v1675_v0 }
  0xb6   : > { %1240 = vmatpush3.msra.mxu0 %v645_v41 }
  0xb7   : > { %1241 = vmatprep.subr.mxu0 %v1675_v0 }
  0xb8   : > { %1242 = vmatpush3.msra.mxu0 %v644_v42 }
  0xb9   : > { %1243 = vmatprep.subr.mxu0 %v1675_v0 }
  0xba   : > { %1244 = vmatpush3.msra.mxu0 %v643_v43 }
  0xbb   : > { %1245 = vmatprep.subr.mxu0 %v1675_v0 }
  0xbc   : > { %1246 = vmatpush3.msra.mxu0 %v642_v44 }
  0xbd   : > { %1247 = vmatprep.subr.mxu0 %v1675_v0 }
  0xbe   : > { %1248 = vmatpush3.msra.mxu0 %v641_v45 }
  0xbf   : > { %1249 = vmatprep.subr.mxu0 %v1675_v0 }
  0xc0   : > { %1250 = vmatpush3.msra.mxu0 %v640_v46 }
  0xc1   : > { %1251 = vmatprep.subr.mxu0 %v1675_v0 }
  0xc2   : > { %1252 = vmatpush3.msra.mxu0 %v639_v52 }
  0xc3   : > { %1253 = vmatprep.subr.mxu0 %v1675_v0 }
  0xc4   : > { %1254 = vmatpush3.msra.mxu0 %v638_v53 }
  0xc5   : > { %1255 = vmatprep.subr.mxu0 %v1675_v0 }
  0xc6   : > { %1256 = vmatpush3.msra.mxu0 %v637_v54 }
  0xc7   : > { %1295 = vmatprep.subr.mxu0 %v1675_v0 }
 0x166   : > { %v538_v48 = vpop.f32.mrf.mxu0 }
 0x167   : > { %v539_v49 = vadd.f32 %v1062_v47, %v538_v48 }
 0x168   : > { %v1189_v50 = vpop.f32.mrf.mxu0 }
 0x169   : > { %v542_v51 = vmax.f32 %v539_v49, 0.0 }
 0x16b   : > { %1223 = vmatmul.mubr.f32.vlgmr.msra.gmra.mxu1 %v542_v51 }
 0x16c   : > { %1292 = vmatprep.mubr.msk.f32.mxu1 %vm1676_vm0, %v1675_v0  ;;  %1261 = vmatpush3.msra.mxu1 %v746_v55 }
 0x16d   : > { %1262 = vmatprep.subr.mxu1 %v1675_v0 }
 0x16e   : > { %1263 = vmatpush3.msra.mxu1 %v745_v56 }
 0x16f   : > { %1264 = vmatprep.subr.mxu1 %v1675_v0 }
 0x170   : > { %1265 = vmatpush3.msra.mxu1 %v744_v57 }
 0x171   : > { %1266 = vmatprep.subr.mxu1 %v1675_v0 }
 0x172   : > { %1267 = vmatpush3.msra.mxu1 %v743_v58 }
 0x173   : > { %1268 = vmatprep.subr.mxu1 %v1675_v0 }
 0x174   : > { %1269 = vmatpush3.msra.mxu1 %v742_v59 }
 0x175   : > { %1270 = vmatprep.subr.mxu1 %v1675_v0 }
 0x176   : > { %1271 = vmatpush3.msra.mxu1 %v741_v60 }
 0x177   : > { %1272 = vmatprep.subr.mxu1 %v1675_v0 }
 0x178   : > { %1273 = vmatpush3.msra.mxu1 %v740_v61 }
 0x179   : > { %1274 = vmatprep.subr.mxu1 %v1675_v0 }
 0x17a   : > { %1275 = vmatpush3.msra.mxu1 %v739_v62 }
 0x17b   : > { %1276 = vmatprep.subr.mxu1 %v1675_v0 }
 0x17c   : > { %1277 = vmatpush3.msra.mxu1 %v738_v63 }
 0x17d   : > { %1278 = vmatprep.subr.mxu1 %v1675_v0 }
 0x17e   : > { %1279 = vmatpush3.msra.mxu1 %v737_v1 }
 0x17f   : > { %1280 = vmatprep.subr.mxu1 %v1675_v0 }
 0x180   : > { %1281 = vmatpush3.msra.mxu1 %v736_v2 }
 0x181   : > { %1282 = vmatprep.subr.mxu1 %v1675_v0 }
 0x182   : > { %1283 = vmatpush3.msra.mxu1 %v735_v3 }
 0x183   : > { %1284 = vmatprep.subr.mxu1 %v1675_v0 }
 0x184   : > { %1285 = vmatpush3.msra.mxu1 %v734_v4 }
 0x185   : > { %1286 = vmatprep.subr.mxu1 %v1675_v0 }
 0x186   : > { %1287 = vmatpush3.msra.mxu1 %v733_v10 }
 0x187   : > { %1288 = vmatprep.subr.mxu1 %v1675_v0 }
 0x188   : > { %1289 = vmatpush3.msra.mxu1 %v732_v11 }
 0x189   : > { %1290 = vmatprep.subr.mxu1 %v1675_v0 }
 0x18a   : > { %1291 = vmatpush3.msra.mxu1 %v731_v12 }
 0x22b   : > { %v632_v6 = vpop.f32.mrf.mxu1 }
 0x22c   : > { %v633_v7 = vadd.f32 %v1063_v5, %v632_v6 }
 0x22d   : > { %v1224_v8 = vpop.f32.mrf.mxu1 }
 0x22e   : > { %v636_v9 = vmax.f32 %v633_v7, 0.0 }
 0x230   : > { %1258 = vmatmul.mubr.f32.vlgmr.msra.gmra.mxu0 %v636_v9 }
 0x231   : > { %1327 = vmatprep.mubr.msk.f32.mxu0 %vm1676_vm0, %v1675_v0  ;;  %1296 = vmatpush3.msra.mxu0 %v840_v13 }
 0x232   : > { %1297 = vmatprep.subr.mxu0 %v1675_v0 }
 0x233   : > { %1298 = vmatpush3.msra.mxu0 %v839_v14 }
 0x234   : > { %1299 = vmatprep.subr.mxu0 %v1675_v0 }
 0x235   : > { %1300 = vmatpush3.msra.mxu0 %v838_v15 }
 0x236   : > { %1301 = vmatprep.subr.mxu0 %v1675_v0 }
 0x237   : > { %1302 = vmatpush3.msra.mxu0 %v837_v16 }
 0x238   : > { %1303 = vmatprep.subr.mxu0 %v1675_v0 }
 0x239   : > { %1304 = vmatpush3.msra.mxu0 %v836_v17 }
 0x23a   : > { %1305 = vmatprep.subr.mxu0 %v1675_v0 }
 0x23b   : > { %1306 = vmatpush3.msra.mxu0 %v835_v18 }
 0x23c   : > { %1307 = vmatprep.subr.mxu0 %v1675_v0 }
 0x23d   : > { %1308 = vmatpush3.msra.mxu0 %v834_v19 }
 0x23e   : > { %1309 = vmatprep.subr.mxu0 %v1675_v0 }
 0x23f   : > { %1310 = vmatpush3.msra.mxu0 %v833_v20 }
 0x240   : > { %1311 = vmatprep.subr.mxu0 %v1675_v0 }
 0x241   : > { %1312 = vmatpush3.msra.mxu0 %v832_v21 }
 0x242   : > { %1313 = vmatprep.subr.mxu0 %v1675_v0 }
 0x243   : > { %1314 = vmatpush3.msra.mxu0 %v831_v22 }
 0x244   : > { %1315 = vmatprep.subr.mxu0 %v1675_v0 }
 0x245   : > { %1316 = vmatpush3.msra.mxu0 %v830_v23 }
 0x246   : > { %1317 = vmatprep.subr.mxu0 %v1675_v0 }
 0x247   : > { %1318 = vmatpush3.msra.mxu0 %v829_v24 }
 0x248   : > { %1319 = vmatprep.subr.mxu0 %v1675_v0 }
 0x249   : > { %1320 = vmatpush3.msra.mxu0 %v828_v25 }
 0x24a   : > { %1321 = vmatprep.subr.mxu0 %v1675_v0 }
 0x24b   : > { %1322 = vmatpush3.msra.mxu0 %v827_v31 }
 0x24c   : > { %1323 = vmatprep.subr.mxu0 %v1675_v0 }
 0x24d   : > { %1324 = vmatpush3.msra.mxu0 %v826_v32 }
 0x24e   : > { %1325 = vmatprep.subr.mxu0 %v1675_v0 }
 0x24f   : > { %1326 = vmatpush3.msra.mxu0 %v825_v33 }
 0x2f0   : > { %v726_v27 = vpop.f32.mrf.mxu0 }
 0x2f1   : > { %v727_v28 = vadd.f32 %v1064_v26, %v726_v27 }
 0x2f2   : > { %v1259_v29 = vpop.f32.mrf.mxu0 }
 0x2f3   : > { %v730_v30 = vmax.f32 %v727_v28, 0.0 }
 0x2f5   : > { %1293 = vmatmul.mubr.f32.vlgmr.msra.gmra.mxu1 %v730_v30 }
 0x3b5   : > { %v820_v35 = vpop.f32.mrf.mxu1 }
 0x3b6   : > { %v821_v36 = vadd.f32 %v1065_v34, %v820_v35 }
 0x3b7   : > { %v1294_v37 = vpop.f32.mrf.mxu1 }
 0x3b8   : > { %v824_v38 = vmax.f32 %v821_v36, 0.0 }
 0x3ba   : > { %1328 = vmatmul.mubr.f32.vlgmr.msra.gmra.mxu0 %v824_v38 }
 0x47a   : > { %v907_v0 = vpop.f32.mrf.mxu0 }
 0x47b   : > { %911 = vst [vmem:[%s447_s24] sm:$0xff] %v907_v0 }
 0x47c   : > { %v1329_v39 = vpop.f32.mrf.mxu0 }
 0x47d   : > { %1602 = shalt.err (!%p1599_p1)
}
 0x47e   : > { %s1603_s27 = scalar_lea.hbm %s2035_s9, 128  ;;  %s1607_s23 = scalar_lea.hbm %s2085_s10, 384 }
 0x47f   : > { %p1604_p3 = scmp.ne.s32.totalorder %s2035_s9, %s1603_s27  ;;  %p1608_p10 = scmp.lt.s32.totalorder %s2035_s9, %s2085_s10 }
 0x480   : > { %p1609_p11 = scmp.lt.s32.totalorder %s1607_s23, %s1603_s27 }
 0x481   : > { %p1605_p7 = pnand %p1604_p3, %p2115_p4 }
 0x482   : > { %p1610_p12 = por %p1609_p11, %p1608_p10 }
 0x483   : > { %p1606_p5 = pneg %p1605_p7 }
 0x485   : > { %p1611_p2 = pnand %p1610_p12, %p1606_p5 }
 0x487   : > { %1614 = shalt.err (!%p1611_p2)
}
 0x488   : > { %1352 = dma.vmem_to_hbm [thread:$0]  (%p2115_p4), %s2030_s25, 128, %s2035_s9, %s913_s1  }
 0x489 PF: > { %p1389_p8 = scmp.ge.s32.totalorder %s1665_s16, 2  ;;  %s938_s24 = sand.u32 1, %s1653_s13  }
 0x48a   : > { %p2116_p9 = scmp.ne.s32.totalorder %s2105_s12, 0  ;;  %s939_s22 = scalar_lea.sflag [#allocation4], %s938_s24 }
 0x48c   : > { %p1375_p6 = pnand %p1389_p8, %p2116_p9 }
 0x48e   : > { %p1376_p13 = pneg %p1375_p6 }
 0x490   : > { %1648 = dma.done.wait (%p1376_p13), %s939_s22, 128  }
 0x491   : > { %1650 = vsyncadd (%p1376_p13), %s939_s22, 4294967168  ;;  %p26_p0 = scmp.ge.s32.totalorder %s1843_s26, 5   ;;  %s2117_s13 = smov %s1657_s14 }
 0x492   : > { %s2118_s14 = smov %s1661_s15  ;;  %s2119_s15 = smov %s1855_s11 }
 0x493   : > { %s2120_s16 = smov %s1843_s26  ;;  %28 = sbr.rel (!%p26_p0) target bundleno = 14 (0xe), region = 125 }
 0x498   :  { %944 = vsyncpa [#allocation3], 1 }
 0x499   :  { %946 = vsyncpa [#allocation3 + $0x1], 1 }
 0x49a   :  { %947 = vsyncpa [#allocation6], 1 }
 0x49b   :  { %948 = vsyncpa [#allocation9], 1 }
 0x49c   :  { %949 = vsyncpa [#allocation12], 1 }
 0x49d   :  { %950 = vsyncpa [#allocation4], 1 }
 0x49e   :  { %952 = vsyncpa [#allocation4 + $0x1], 1 }

</bundles_post_ra>
